<compile_context>
chip_gen: v5e
topology: v5e:2x2
jax: 0.10.0
libtpu: 0.0.40
codegen_flags: <defaults>
</compile_context>

<pallas_src>
import math

import jax
import jax.numpy as jnp
import numpy as np
from jax.experimental import pallas as pl
from jax.experimental.pallas import tpu as pltpu


def _round_up(x, m):
    return (x + m - 1) // m * m


def _sgn_kernel(x_ref, w_ref, g_ref, h_ref, o_ref):
    """One (channel-block, batch-block) grid step.

    x_ref: (Bb, N, Cb)  native dtype        o_ref: (Bb, N, Cb) out dtype
    w_ref: (2, Fp, Cb)  f32 gating weights (re, im), rows F..Fp zero-padded
    g_ref: (2*Fp, N)    stacked [Re; Im] forward rfft2 operator (matmul dtype)
    h_ref: (N, 2*Fp)    stacked [Re | Im] inverse irfft2 operator (matmul dtype)
    """
    g2 = g_ref[...]
    h2 = h_ref[...]
    wr = w_ref[0]                                   # (Fp, Cb) f32
    wi = w_ref[1]
    fp = wr.shape[0]
    mm_dtype = g2.dtype
    bb = x_ref.shape[0]

    for i in range(bb):                             # small static unroll over batch slices
        x = x_ref[i].astype(mm_dtype)                                   # (N, Cb)
        # Fused forward rfft2: Re and Im rows in a single MXU pass.
        u = jnp.dot(g2, x, preferred_element_type=jnp.float32)          # (2Fp, Cb) f32
        ur = u[:fp]
        ui = u[fp:]
        # Complex spectral gating in f32; channels on lanes -> full-width VPU ops.
        vr = ur * wr - ui * wi
        vi = ur * wi + ui * wr
        v = jnp.concatenate([vr, vi], axis=0).astype(mm_dtype)          # (2Fp, Cb)
        # Fused inverse irfft2 (Hermitian doubling + DC/Nyquist handling baked in).
        y = jnp.dot(h2, v, preferred_element_type=jnp.float32)          # (N, Cb) f32
        o_ref[i] = y.astype(o_ref.dtype)


def _spectral_operators(a, b, f_pad, dtype):
    """Stacked dense real operators for ortho rfft2 / irfft2 on an (a, b) grid.

    Returns
      g2: (2*f_pad, N)  rows [0:F] = Re(forward), rows [f_pad:f_pad+F] = Im(forward)
      h2: (N, 2*f_pad)  cols [0:F] = Re-path,    cols [f_pad:f_pad+F] = Im-path
    with N = a*b (row-major spatial), F = a*wf (row-major half-spectrum),
    wf = b // 2 + 1, so that  y = h2 @ concat([gate_r, gate_i])  reproduces irfft2.
    """
    wf = b // 2 + 1
    n = a * b
    f = a * wf
    scale = 1.0 / np.sqrt(a * b)

    p = np.arange(a, dtype=np.float64)
    theta = 2.0 * np.pi * np.outer(p, p) / a                     # theta[p, m]
    nn = np.arange(b, dtype=np.float64)
    q = np.arange(wf, dtype=np.float64)
    phi = 2.0 * np.pi * np.outer(nn, q) / b                      # phi[n, q]

    # Forward: Xhat[m, q] = scale * sum_{p, n} x[p, n] * e^{-i(theta_pm + phi_qn)}
    ang_f = theta.T[:, None, :, None] + phi.T[None, :, None, :]  # (m, q, p, n)
    gr = (np.cos(ang_f) * scale).reshape(f, n)
    gi = (-np.sin(ang_f) * scale).reshape(f, n)

    # Inverse with Hermitian doubling (cq) and exact DC/Nyquist imag-drop.
    cq = np.full(wf, 2.0)
    cq[0] = 1.0
    if b % 2 == 0:
        cq[b // 2] = 1.0
    cos_t, sin_t = np.cos(theta), np.sin(theta)                  # (p, m)
    cos_p, sin_p = np.cos(phi), np.sin(phi)                      # (n, q)
    sin_p[:, 0] = 0.0
    if b % 2 == 0:
        sin_p[:, b // 2] = 0.0
    ct = cos_t[:, None, :, None]
    st = sin_t[:, None, :, None]                                 # (p, 1, m, 1)
    cp = cos_p[None, :, None, :]
    sp = sin_p[None, :, None, :]                                 # (1, n, 1, q)
    w4 = (scale * cq)[None, None, None, :]
    hr = (w4 * (ct * cp - st * sp)).reshape(n, f)
    hi = (-w4 * (st * cp + ct * sp)).reshape(n, f)

    g2 = np.zeros((2 * f_pad, n), dtype=np.float64)
    g2[:f] = gr
    g2[f_pad:f_pad + f] = gi
    h2 = np.zeros((n, 2 * f_pad), dtype=np.float64)
    h2[:, :f] = hr
    h2[:, f_pad:f_pad + f] = hi
    return jnp.asarray(g2, dtype=dtype), jnp.asarray(h2, dtype=dtype)


def _pick_channel_block(c_pad):
    """Largest lane-dense channel block that divides the padded channel count."""
    for cand in (512, 384, 256, 128):
        if c_pad % cand == 0:
            return cand
    return c_pad


def _pick_batch_block(B, n_cb, N, c_blk, x_bytes, out_bytes,
                      vmem_budget=20 * 1024 * 1024):
    """Largest batch block whose double-buffered x+out tiles fit the VMEM budget
    (budget chosen to respect the v7x 64 MiB / 32 MiB-scoped VMEM) while keeping
    >= 2 grid steps whenever possible (two TensorCores on v7x)."""
    best = 1
    for cand in range(1, min(B, 16) + 1):
        if B % cand:
            continue
        bufs = 2 * cand * N * c_blk * (x_bytes + out_bytes)   # 2-deep pipeline, x + out
        if bufs > vmem_budget:
            continue
        if n_cb * (B // cand) < 2 and cand > 1:
            continue
        best = cand
    return best


def spectral_gating_network(x, complex_weight, spatial_size=None, *,
                            matmul_dtype=jnp.bfloat16, out_dtype=None):
    """Pallas forward of SpectralGatingNetwork.

    x: (B, N, C); complex_weight: (h, w, C, 2) with h == a, w == b // 2 + 1.
    Returns (B, N, C) in `out_dtype` (defaults to x.dtype).
    """
    B, N, C = x.shape
    if spatial_size is None:
        a = b = int(math.sqrt(N))
    else:
        a, b = spatial_size
    assert a * b == N, "spatial grid does not match sequence length"
    wf = b // 2 + 1
    F = a * wf
    assert complex_weight.shape == (a, wf, C, 2), "weight shape mismatch with spatial grid"

    if out_dtype is None:
        # TODO(synk): the PyTorch module always returns float32; pass
        # out_dtype=jnp.float32 to reproduce that exactly for bf16 inputs.
        out_dtype = x.dtype
    out_dtype = np.dtype(out_dtype)

    Fp = _round_up(F, 8)                   # sublane-aligned half-spectrum rows
    c_pad = _round_up(C, 128)              # lane-dense channel axis

    g2, h2 = _spectral_operators(a, b, Fp, matmul_dtype)          # (2Fp,N), (N,2Fp)

    wr = complex_weight[..., 0].reshape(F, C)
    wi = complex_weight[..., 1].reshape(F, C)
    pad_w = ((0, Fp - F), (0, c_pad - C))
    w_pack = jnp.stack([jnp.pad(wr, pad_w), jnp.pad(wi, pad_w)],
                       axis=0).astype(jnp.float32)                # (2, Fp, c_pad)

    x_in = x if c_pad == C else jnp.pad(x, ((0, 0), (0, 0), (0, c_pad - C)))

    c_blk = _pick_channel_block(c_pad)
    n_cb = c_pad // c_blk
    bb = _pick_batch_block(B, n_cb, N, c_blk,
                           x_in.dtype.itemsize, out_dtype.itemsize)
    n_bb = B // bb

    flops = int(B * c_pad * (8 * Fp * N + 6 * Fp))
    bytes_accessed = int(x_in.size * x_in.dtype.itemsize
                         + B * N * c_pad * out_dtype.itemsize
                         + w_pack.size * 4
                         + g2.size * g2.dtype.itemsize
                         + h2.size * h2.dtype.itemsize)

    out = pl.pallas_call(
        _sgn_kernel,
        out_shape=jax.ShapeDtypeStruct((B, N, c_pad), out_dtype),
        # Channel blocks outermost: per-channel-block weights and the DFT
        # constants stay resident across the whole batch loop.
        grid=(n_cb, n_bb),
        in_specs=[
            pl.BlockSpec((bb, N, c_blk), lambda cb, ib: (ib, 0, cb)),   # x  (Bb, N, Cb)
            pl.BlockSpec((2, Fp, c_blk), lambda cb, ib: (0, 0, cb)),    # W  (2, Fp, Cb)
            pl.BlockSpec((2 * Fp, N),    lambda cb, ib: (0, 0)),        # G2 (const)
            pl.BlockSpec((N, 2 * Fp),    lambda cb, ib: (0, 0)),        # H2 (const)
        ],
        out_specs=pl.BlockSpec((bb, N, c_blk), lambda cb, ib: (ib, 0, cb)),
        compiler_params=pltpu.CompilerParams(
            dimension_semantics=("parallel", "parallel"),
            vmem_limit_bytes=32 * 1024 * 1024),
        cost_estimate=pl.CostEstimate(
            flops=flops, transcendentals=0, bytes_accessed=bytes_accessed),
    )(x_in, w_pack, g2, h2)

    if c_pad != C:
        out = out[..., :C]
    return out


if __name__ == "__main__":
    def _reference(x, cw, a, b):
        B, N, C = x.shape
        x4 = x.astype(jnp.float32).reshape(B, a, b, C)
        w_c = cw[..., 0].astype(jnp.float32) + 1j * cw[..., 1].astype(jnp.float32)
        y = jnp.fft.irfft2(
            jnp.fft.rfft2(x4, axes=(1, 2), norm="ortho") * w_c,
            s=(a, b), axes=(1, 2), norm="ortho")
        return y.reshape(B, N, C)

    def _check(key, B, C, a, b, dtype=jnp.float32, atol=5e-3):
        k_x, k_w = jax.random.split(key)
        N = a * b
        wf = b // 2 + 1
        x = jax.random.normal(k_x, (B, N, C), dtype=jnp.float32).astype(dtype)
        # deterministic stand-in for torch.randn(h, w, dim, 2) * 0.02
        cw = jax.random.normal(k_w, (a, wf, C, 2), dtype=jnp.float32) * 0.02

        out = jax.block_until_ready(spectral_gating_network(x, cw, spatial_size=(a, b)))
        ref = _reference(x, cw, a, b)
        np.testing.assert_allclose(np.asarray(out, dtype=np.float32),
                                   np.asarray(ref), atol=atol, rtol=5e-2)

    keys = jax.random.split(jax.random.PRNGKey(0), 3)
    _check(keys[0], B=2, C=32, a=8, b=8)                               # padded-channel path
    _check(keys[1], B=2, C=32, a=11, b=11)                             # module default (h=11, w=6)
    _check(keys[2], B=4, C=256, a=8, b=8, dtype=jnp.bfloat16, atol=1e-2)  # native bf16 + batch blocking
    print("KERNEL_OK")
</pallas_src>

<mosaic_0001>
module attributes {stable_mosaic.version = 11 : i64} {
  func.func @_sgn_kernel(%arg0: i32, %arg1: i32, %arg2: memref<1x64x128xf32, #tpu.memory_space<vmem>>, %arg3: memref<2x40x128xf32, #tpu.memory_space<vmem>>, %arg4: memref<80x64xbf16, #tpu.memory_space<vmem>>, %arg5: memref<64x80xbf16, #tpu.memory_space<vmem>>, %arg6: memref<1x64x128xf32, #tpu.memory_space<vmem>>) attributes {dimension_semantics = [#tpu.dimension_semantics<parallel>, #tpu.dimension_semantics<parallel>], iteration_bounds = array<i64: 1, 2>, scalar_prefetch = 0 : i64, scratch_operands = 0 : i64, tpu.core_type = #tpu.core_type<tc>, window_params = [{transform_indices = @transform_0, window_bounds = array<i64: 1, 64, 128>}, {transform_indices = @transform_1, window_bounds = array<i64: 2, 40, 128>}, {pipeline_mode = #tpu.pipeline_mode<synchronous>, transform_indices = @transform_2, window_bounds = array<i64: 80, 64>}, {pipeline_mode = #tpu.pipeline_mode<synchronous>, transform_indices = @transform_3, window_bounds = array<i64: 64, 80>}, {transform_indices = @transform_4, window_bounds = array<i64: 1, 64, 128>}]} {
    %c0 = arith.constant 0 : index
    %c0_0 = arith.constant 0 : index
    %0 = vector.load %arg4[%c0, %c0_0] : memref<80x64xbf16, #tpu.memory_space<vmem>>, vector<80x64xbf16>
    %c0_1 = arith.constant 0 : index
    %c0_2 = arith.constant 0 : index
    %1 = vector.load %arg5[%c0_1, %c0_2] : memref<64x80xbf16, #tpu.memory_space<vmem>>, vector<64x80xbf16>
    %c0_3 = arith.constant 0 : index
    %c0_4 = arith.constant 0 : index
    %c0_5 = arith.constant 0 : index
    %2 = vector.load %arg3[%c0_3, %c0_4, %c0_5] : memref<2x40x128xf32, #tpu.memory_space<vmem>>, vector<1x40x128xf32>
    %3 = vector.shape_cast %2 : vector<1x40x128xf32> to vector<40x128xf32>
    %c1 = arith.constant 1 : index
    %c0_6 = arith.constant 0 : index
    %c0_7 = arith.constant 0 : index
    %4 = vector.load %arg3[%c1, %c0_6, %c0_7] : memref<2x40x128xf32, #tpu.memory_space<vmem>>, vector<1x40x128xf32>
    %5 = vector.shape_cast %4 : vector<1x40x128xf32> to vector<40x128xf32>
    %c0_8 = arith.constant 0 : index
    %c0_9 = arith.constant 0 : index
    %c0_10 = arith.constant 0 : index
    %6 = vector.load %arg2[%c0_8, %c0_9, %c0_10] : memref<1x64x128xf32, #tpu.memory_space<vmem>>, vector<1x64x128xf32>
    %7 = vector.shape_cast %6 : vector<1x64x128xf32> to vector<64x128xf32>
    %8 = arith.truncf %7 : vector<64x128xf32> to vector<64x128xbf16>
    %cst = arith.constant dense<0.000000e+00> : vector<80x128xf32>
    %9 = tpu.matmul %0, %8, %cst {dimension_numbers = #tpu.dot_dimension_numbers<[1], [0], [0], [1], [0, 0, 1, 1], [], []>} : vector<80x64xbf16>, vector<64x128xbf16>, vector<80x128xf32> -> vector<80x128xf32>
    %10 = vector.extract_strided_slice %9 {offsets = [0, 0], sizes = [40, 128], strides = [1, 1]} : vector<80x128xf32> to vector<40x128xf32>
    %11 = vector.extract_strided_slice %9 {offsets = [40, 0], sizes = [40, 128], strides = [1, 1]} : vector<80x128xf32> to vector<40x128xf32>
    %12 = arith.mulf %10, %3 : vector<40x128xf32>
    %13 = arith.mulf %11, %5 : vector<40x128xf32>
    %14 = arith.subf %12, %13 : vector<40x128xf32>
    %15 = arith.mulf %10, %5 : vector<40x128xf32>
    %16 = arith.mulf %11, %3 : vector<40x128xf32>
    %17 = arith.addf %15, %16 : vector<40x128xf32>
    %18 = tpu.concatenate %14, %17 in 0 : vector<40x128xf32>, vector<40x128xf32> -> vector<80x128xf32>
    %19 = arith.truncf %18 : vector<80x128xf32> to vector<80x128xbf16>
    %cst_11 = arith.constant dense<0.000000e+00> : vector<64x128xf32>
    %20 = tpu.matmul %1, %19, %cst_11 {dimension_numbers = #tpu.dot_dimension_numbers<[1], [0], [0], [1], [0, 0, 1, 1], [], []>} : vector<64x80xbf16>, vector<80x128xbf16>, vector<64x128xf32> -> vector<64x128xf32>
    %c0_12 = arith.constant 0 : index
    %c0_13 = arith.constant 0 : index
    %c0_14 = arith.constant 0 : index
    %21 = vector.load %arg6[%c0_12, %c0_13, %c0_14] : memref<1x64x128xf32, #tpu.memory_space<vmem>>, vector<1x64x128xf32>
    %22 = vector.shape_cast %21 : vector<1x64x128xf32> to vector<64x128xf32>
    %23 = vector.shape_cast %20 : vector<64x128xf32> to vector<1x64x128xf32>
    tpu.vector_store %arg6[%c0_12, %c0_13, %c0_14], %23 {strides = array<i32>} : memref<1x64x128xf32, #tpu.memory_space<vmem>>, vector<1x64x128xf32>,
    return
  }
  func.func @transform_0(%arg0: i32, %arg1: i32) -> (i32, i32, i32) {
    %c0_i32 = arith.constant 0 : i32
    %c0_i32_0 = arith.constant 0 : i32
    return %arg1, %c0_i32, %arg0 : i32, i32, i32
  }
  func.func @transform_1(%arg0: i32, %arg1: i32) -> (i32, i32, i32) {
    %c0_i32 = arith.constant 0 : i32
    %c0_i32_0 = arith.constant 0 : i32
    %c0_i32_1 = arith.constant 0 : i32
    return %c0_i32, %c0_i32_0, %arg0 : i32, i32, i32
  }
  func.func @transform_2(%arg0: i32, %arg1: i32) -> (i32, i32) {
    %c0_i32 = arith.constant 0 : i32
    %c0_i32_0 = arith.constant 0 : i32
    %c0_i32_1 = arith.constant 0 : i32
    return %c0_i32, %c0_i32_0 : i32, i32
  }
  func.func @transform_3(%arg0: i32, %arg1: i32) -> (i32, i32) {
    %c0_i32 = arith.constant 0 : i32
    %c0_i32_0 = arith.constant 0 : i32
    %c0_i32_1 = arith.constant 0 : i32
    return %c0_i32, %c0_i32_0 : i32, i32
  }
  func.func @transform_4(%arg0: i32, %arg1: i32) -> (i32, i32, i32) {
    %c0_i32 = arith.constant 0 : i32
    %c0_i32_0 = arith.constant 0 : i32
    return %arg1, %c0_i32, %arg0 : i32, i32, i32
  }
}

</mosaic_0001>

<bundles_post_ra>
// kernel: tpu_custom_call.1
= control target key start
LH: loop header
LB: loop body
LE: loop exit
PB: predicated region body
PF: predicated region fallthrough
CT: control target
= control target key end

     0   :  { %s1118_s0 = inlined_call_operand.hbm [shape: f32[2,64,128], index: 0, kind: input, shape index: {}]   ;;  %s1119_s1 = inlined_call_operand.hbm [shape: f32[2,40,128], index: 1, kind: input, shape index: {}]   ;;  %s1120_s2 = inlined_call_operand.vmem [shape: bf16[80,64], index: 2, kind: input, shape index: {}]   ;;  %s1121_s3 = inlined_call_operand.vmem [shape: bf16[64,80], index: 3, kind: input, shape index: {}]   ;;  %s1122_s4 = inlined_call_operand.hbm [shape: f32[2,64,128], index: 4, kind: output, shape index: {}]  }
   0x1   :  { %1126 = sst [smem:[#allocation12_spill]] %s1119_s1 }
   0x2   :  { %9 = vsyncpa [#allocation3], 0 }
   0x3   :  { %11 = vsyncpa [#allocation3 + $0x1], 0 }
   0x4   :  { %12 = vsyncpa [#allocation6], 0 }
   0x5   :  { %13 = vsyncpa [#allocation4], 0 }
   0x6   :  { %15 = vsyncpa [#allocation4 + $0x1], 0  ;;  %s932_s15 = smov 0   ;;  %s934_s16 = smov 0  }
   0x7   :  { %s936_s17 = smov 0   ;;  %s938_s18 = smov 0  }
   0x8   :  { %s940_s19 = smov 0   ;;  %s942_s20 = smov 0  }
   0x9 LB: > { %s595_s21 = sadd.s32 4294967295, %s900_s20   ;;  %s596_s22 = sadd.s32 4294967294, %s900_s20   ;;  %s900_s20 = sphi %s942_s20, %s21_s20   ;;  %s896_s19 = sphi %s940_s19, %s1143_s19   ;;  %s892_s18 = sphi %s938_s18, %s1142_s18   ;;  %s888_s17 = sphi %s936_s17, %s1141_s17   ;;  %s884_s16 = sphi %s934_s16, %s1140_s16   ;;  %s880_s15 = sphi %s932_s15, %s1139_s15  }
   0xa   : > { %p55_p0 = scmp.ne.s32.totalorder %s884_s16, %s880_s15  ;;  %p966_p1 = scmp.eq.s32.totalorder %s595_s21, 0 }
   0xb   : > { %p970_p2 = scmp.eq.s32.totalorder %s595_s21, 1  ;;  %p155_p3 = scmp.eq.s32.totalorder %s596_s22, 1 }
   0xc   : > { %p976_p4 = por %p966_p1, %p55_p0  ;;  %p597_p5 = scmp.ge.s32.totalorder %s900_s20, 1 }
   0xd   : > { %p981_p6 = por %p155_p3, %p55_p0  ;;  %p162_p7 = scmp.lt.s32.totalorder %s900_s20, 3 }
   0xe   : > { %s1131_s1 = sld [smem:[#allocation12_spill]]  ;;  %s902_s5 = smov [#allocation5]  }
   0xf   : > { %p989_p8 = pnand %p597_p5, %p162_p7  ;;  %s177_s6 = sshll.u32 %s902_s5, 4  ;;  %s178_s6 = int_to_ptr.vmem [resolvable:$true] %s177_s6 }
  0x10   : > { %p599_p11 = scmp.ge.s32.totalorder %s900_s20, 2  ;;  %s1123_s7 = smov 128  }
  0x11   : > { %p685_p9 = pneg %p989_p8  ;;  %s1124_s8 = smov 8  }
  0x12   : > { %s30_s9 = sadd.s32 1, %s896_s19  ;;  %s42_s10 = sadd.s32 1, %s888_s17 }
  0x13   : > { %p686_p10 = pnand %p685_p9, %p966_p1  ;;  %p31_p12 = scmp.ge.s32.totalorder %s30_s9, 2 }
  0x14   : > { %s175_s29 = sshll.u32 %s1131_s1, 4  ;;  %p49_p13 = scmp.ne.s32.totalorder %s888_s17, %s884_s16  ;;  %s176_s29 = int_to_ptr.hbm [resolvable:$true] %s175_s29 }
  0x15   : > { %688 = dma.hbm_to_vmem [thread:$0]  (!%p686_p10), %s176_s29, 1280, %s178_s6, [#allocation6], %s1123_s7, %s1123_s7, %s1124_s8  }
  0x16   : > { %p50_p0 = scmp.eq.s32.totalorder %s900_s20, 0  ;;  %s1145_s9 = smov (%p31_p12, %s30_s9), 0 }
  0x17   : > { %1133 = sst [smem:[#allocation11_spill]] %s1145_s9  ;;  %p1014_p5 = por %p970_p2, %p49_p13 }
  0x18   : > { %p1008_p3 = por %p50_p0, %p49_p13  ;;  %s37_s13 = ssub.s32 %s896_s19, %s1145_s9 }
  0x19   : > { %p698_p7 = scmp.lt.s32.totalorder %s900_s20, 2  ;;  %p40_p9 = scmp.eq.s32.totalorder %s37_s13, 0 }
  0x1a   : > { %s197_s14 = sand.u32 1, %s888_s17   ;;  %s657_s27 = sshll.u32 %s896_s19, 6 }
  0x1b   : > { %s600_s21 = sshll.u32 %s197_s14, 6  ;;  %s207_s5 = scalar_lea.hbm %s1118_s0, %s657_s27 }
  0x1c   : > { %s1023_s22 = scalar_select %p40_p9, %s888_s17, %s42_s10  }
  0x1d   : > { %s201_s6 = scalar_lea.vmem [#allocation2], %s600_s21  ;;  %s208_s24 = sshll.u32 %s207_s5, 4  ;;  %s209_s24 = int_to_ptr.hbm [resolvable:$true] %s208_s24 }
  0x1e   : > { %s210_s7 = sshll.u32 %s201_s6, 4  ;;  %p690_p2 = pnand %p698_p7, %p1008_p3  ;;  %s211_s7 = int_to_ptr.vmem [resolvable:$true] %s210_s7 }
  0x1f   : > { %s198_s8 = scalar_lea.sflag [#allocation3], %s197_s14  ;;  %s1136_s1 = smov 8  }
  0x20   : > { %s1137_s9 = smov 128   ;;  %222 = sbr.rel (%p989_p8) target bundleno = 417 (0x1a1), region = 36 }
  0x21   : > { %692 = dma.hbm_to_vmem [thread:$0]  (!%p690_p2), %s209_s24, 1024, %s211_s7, %s198_s8, %s1137_s9, %s1137_s9, %s1136_s1  }
  0x22   : > { %s1037_s10 = sand.u32 (!%p989_p8), 1, %s884_s16  }
  0x23   : > { %s604_s13 = sshll.u32 (!%p989_p8), %s1037_s10, 6  ;;  %s225_s21 = scalar_lea.sflag (!%p989_p8), [#allocation3], %s1037_s10 }
  0x24   : > { %s228_s11 = scalar_lea.vmem (!%p989_p8), [#allocation2], %s604_s13 }
  0x25   : > { %867 = dma.done.wait (%p976_p4), %s225_s21, 1024  }
  0x26   : > { %869 = vsyncadd (%p976_p4), %s225_s21, 4294966272 }
  0x27   : > { %871 = dma.done.wait (%p966_p1), [#allocation6], 1280  }
  0x28   : > { %873 = vsyncadd (%p966_p1), [#allocation6], 4294966016  ;;  %v295_v0 = vld [vmem:[%s228_s11 + $0x30] sm:$0xff]  ;;  %v296_v1 = vld [vmem:[%s228_s11 + $0x38] sm:$0xff]  ;;  %vm326_vm0 = vcmask 523264   ;;  %vm431_vm1 = vcmask 654336  }
  0x29   : > { %v293_v2 = vld [vmem:[%s228_s11 + $0x20] sm:$0xff]  ;;  %v300_v3 = vpack.c.bf16 %v296_v1, %v295_v0  ;;  %v294_v4 = vld [vmem:[%s228_s11 + $0x28] sm:$0xff]  ;;  %v291_v6 = vld [vmem:[%s228_s11 + $0x10] sm:$0xff]  ;;  %s258_s25 = scalar_lea.vmem [#allocation7], %s604_s13  ;;  %s667_s30 = sshll.u32 %s892_s18, 6 }
  0x2a   : > { %v299_v5 = vpack.c.bf16 %v294_v4, %v293_v2  ;;  %v292_v7 = vld [vmem:[%s228_s11 + $0x18] sm:$0xff]  ;;  %v289_v9 = vld [vmem:[%s228_s11] sm:$0xff]  ;;  %v290_v10 = vld [vmem:[%s228_s11 + $0x8] sm:$0xff]  ;;  %s494_s9 = scalar_lea.hbm %s1122_s4, %s667_s30  ;;  %s495_s13 = sshll.u32 %s258_s25, 4  ;;  %s496_s13 = int_to_ptr.vmem [resolvable:$true] %s495_s13 }
  0x2b   : > { %346 = vmatpush.bf16.msra.mxu0 %v300_v3  ;;  %668 = vmatpush.bf16.msra.mxu2 %v300_v3  ;;  %v298_v8 = vpack.c.bf16 %v292_v7, %v291_v6  ;;  %v297_v11 = vpack.c.bf16 %v290_v10, %v289_v9  ;;  %v658_v12 = vld [vmem:[%s1120_s2] sm:$0xff]  ;;  %v661_v13 = vld [vmem:[%s1120_s2 + $0x18] sm:$0xff]  ;;  %v659_v14 = vld [vmem:[%s1120_s2 + $0x8] sm:$0xff]  ;;  %s497_s14 = sshll.u32 %s494_s9, 4  ;;  %s482_s27 = scalar_lea.sflag [#allocation4], %s1037_s10  ;;  %s498_s14 = int_to_ptr.hbm [resolvable:$true] %s497_s14 }
  0x2c   : > { %v662_v15 = vld [vmem:[%s1120_s2 + $0x20] sm:$0xff]  ;;  %v660_v16 = vld [vmem:[%s1120_s2 + $0x10] sm:$0xff]  ;;  %v281_v24 = vld [vmem:[#allocation5 + $0x18] sm:$0xff]  ;;  %s828_s28 = sshra.s32 %s498_s14, 4  ;;  %s834_s6 = scalar_lea.hbm %s1122_s4, 128  ;;  %s829_s28 = int_to_ptr.hbm [resolvable:$true] %s828_s28 }
  0x2d   : > { %v287_v25 = vld [vmem:[#allocation5 + $0x40] sm:$0xff]  ;;  %v279_v26 = vld [vmem:[#allocation5 + $0x8] sm:$0xff]  ;;  %v285_v29 = vld [vmem:[#allocation5 + $0x30] sm:$0xff]  ;;  %s830_s29 = scalar_lea.hbm %s829_s28, 64  ;;  %p835_p10 = scmp.lt.s32.totalorder %s829_s28, %s1122_s4 }
  0x2e   : > { %v282_v27 = vld [vmem:[#allocation5 + $0x20] sm:$0xff]  ;;  %v280_v30 = vld [vmem:[#allocation5 + $0x10] sm:$0xff]  ;;  %v286_v31 = vld [vmem:[#allocation5 + $0x38] sm:$0xff]  ;;  %p831_p1 = scmp.ne.s32.totalorder %s829_s28, %s830_s29  ;;  %p836_p12 = scmp.lt.s32.totalorder %s834_s6, %s830_s29 }
  0x2f   : > { %347 = vmatpush.bf16.msra.mxu0 %v299_v5  ;;  %669 = vmatpush.bf16.msra.mxu2 %v299_v5  ;;  %v288_v35 = vld [vmem:[#allocation5 + $0x48] sm:$0xff]  ;;  %v278_v49 = vld [vmem:[#allocation5] sm:$0xff]  ;;  %v665_v10 = vld [vmem:[%s1121_s3 + $0x10] sm:$0xff] }
  0x30   : > { %v284_v46 = vld [vmem:[#allocation5 + $0x28] sm:$0xff]  ;;  %v663_v9 = vld [vmem:[%s1121_s3] sm:$0xff]  ;;  %p832_p4 = pnand %p831_p1, %p1014_p5  ;;  %p837_p13 = por %p836_p12, %p835_p10 }
  0x32   : > { %p833_p8 = pneg %p832_p4 }
  0x33   : > { %348 = vmatpush.bf16.msra.mxu0 %v298_v8  ;;  %670 = vmatpush.bf16.msra.mxu2 %v298_v8  ;;  %v664_v8 = vld [vmem:[%s1121_s3 + $0x8] sm:$0xff] }
  0x34   : > { %p838_p0 = pnand %p837_p13, %p833_p8 }
  0x37   : > { %349 = vmatpush.bf16.msra.mxu0 %v297_v11  ;;  %671 = vmatpush.bf16.msra.mxu2 %v297_v11  ;;  %v666_v11 = vld [vmem:[%s1121_s3 + $0x18] sm:$0xff] }
  0x3a   : > { %627 = vmatmul.msk.bf16.vlgmr.msra.gmra.mxu0 %vm326_vm0, %v658_v12  ;;  %630 = vmatmul.msk.bf16.vlgmr.msra.gmra.mxu2 %vm326_vm0, %v661_v13 }
  0x4a   : > { %628 = vmatmul.msk.bf16.gmra.mxu0 %vm326_vm0, %v659_v14  ;;  %631 = vmatmul.msk.bf16.gmra.mxu2 %vm326_vm0, %v662_v15 }
  0x5a   : > { %629 = vmatmul.msk.bf16.gmra.mxu0 %vm326_vm0, %v660_v16 }
  0xb7   : > { %v351_v17 = vpop.f32.mrf.mxu0 }
  0xb8   : > { %v391_v51 = vmul.f32 %v351_v17, %v284_v46  ;;  %v376_v0 = vmul.f32 %v351_v17, %v278_v49 }
  0xbd   : > { %v366_v18 = vpop.f32.mrf.mxu2 }
  0xbe   : > { %v397_v39 = vmul.f32 %v366_v18, %v279_v26  ;;  %v382_v1 = vmul.f32 %v366_v18, %v285_v29 }
  0xbf   : > { %v353_v19 = vpop.f32.mrf.mxu0 }
  0xc0   : > { %v392_v40 = vmul.f32 %v353_v19, %v285_v29  ;;  %v377_v2 = vmul.f32 %v353_v19, %v279_v26 }
  0xc2   : > { %v402_v47 = vadd.f32 %v397_v39, %v392_v40  ;;  %v387_v6 = vsub.f32 %v377_v2, %v382_v1 }
  0xc5   : > { %v368_v20 = vpop.f32.mrf.mxu2 }
  0xc6   : > { %v398_v41 = vmul.f32 %v368_v20, %v280_v30  ;;  %v383_v60 = vmul.f32 %v368_v20, %v286_v31 }
  0xc7   : > { %v356_v21 = vpop.f32.mrf.mxu0 }
  0xc8   : > { %v393_v34 = vmul.f32 %v356_v21, %v286_v31  ;;  %v378_v57 = vmul.f32 %v356_v21, %v280_v30 }
  0xca   : > { %v403_v44 = vadd.f32 %v398_v41, %v393_v34  ;;  %v388_v3 = vsub.f32 %v378_v57, %v383_v60 }
  0xcc   : > { %v409_v52 = vpack.c.bf16 %v403_v44, %v402_v47 }
  0xcd   : > { %v371_v22 = vpop.f32.mrf.mxu2 }
  0xce   : > { %v399_v32 = vmul.f32 %v371_v22, %v281_v24  ;;  %v384_v53 = vmul.f32 %v371_v22, %v287_v25 }
  0xcf   : > { %v358_v23 = vpop.f32.mrf.mxu0 }
  0xd0   : > { %v394_v33 = vmul.f32 %v358_v23, %v287_v25  ;;  %v379_v54 = vmul.f32 %v358_v23, %v281_v24 }
  0xd2   : > { %v404_v42 = vadd.f32 %v399_v32, %v394_v33  ;;  %v389_v63 = vsub.f32 %v379_v54, %v384_v53 }
  0xd4   : > { %v407_v5 = vpack.c.bf16 %v389_v63, %v388_v3 }
  0xd5   : > { %v373_v28 = vpop.f32.mrf.mxu2 }
  0xd6   : > { %v400_v37 = vmul.f32 %v373_v28, %v282_v27  ;;  %v385_v55 = vmul.f32 %v373_v28, %v288_v35 }
  0xd7   : > { %v361_v36 = vpop.f32.mrf.mxu0 }
  0xd8   : > { %v395_v38 = vmul.f32 %v361_v36, %v288_v35  ;;  %v380_v48 = vmul.f32 %v361_v36, %v282_v27 }
  0xda   : > { %v405_v43 = vadd.f32 %v400_v37, %v395_v38  ;;  %v390_v59 = vsub.f32 %v380_v48, %v385_v55 }
  0xdc   : > { %v410_v45 = vpack.c.bf16 %v405_v43, %v404_v42 }
  0xde   : > { %447 = vmatpush.bf16.msra.mxu1 %v410_v45  ;;  %672 = vmatpush.bf16.msra.mxu3 %v410_v45 }
  0xdf   : > { %v363_v50 = vpop.f32.mrf.mxu0 }
  0xe0   : > { %v396_v56 = vmul.f32 %v363_v50, %v278_v49  ;;  %v381_v61 = vmul.f32 %v363_v50, %v284_v46 }
  0xe2   : > { %v401_v58 = vadd.f32 %v396_v56, %v391_v51  ;;  %448 = vmatpush.bf16.msra.mxu1 %v409_v52  ;;  %673 = vmatpush.bf16.msra.mxu3 %v409_v52  ;;  %v386_v4 = vsub.f32 %v376_v0, %v381_v61 }
  0xe4   : > { %v408_v62 = vpack.c.bf16 %v401_v58, %v390_v59  ;;  %v406_v7 = vpack.c.bf16 %v387_v6, %v386_v4 }
  0xe6   : > { %449 = vmatpush.bf16.msra.mxu1 %v408_v62  ;;  %674 = vmatpush.bf16.msra.mxu3 %v408_v62 }
  0xea   : > { %450 = vmatpush.bf16.msra.mxu1 %v407_v5  ;;  %675 = vmatpush.bf16.msra.mxu3 %v407_v5 }
  0xee   : > { %451 = vmatpush.bf16.msra.mxu1 %v406_v7  ;;  %676 = vmatpush.bf16.msra.mxu3 %v406_v7 }
  0xf1   : > { %649 = vmatmul.msk.bf16.vlgmr.msra.gmra.mxu3 %vm431_vm1, %v664_v8  ;;  %648 = vmatmul.msk.bf16.vlgmr.msra.gmra.mxu1 %vm431_vm1, %v663_v9 }
 0x101   : > { %650 = vmatmul.msk.bf16.gmra.mxu3 %vm431_vm1, %v665_v10 }
 0x111   : > { %651 = vmatmul.msk.bf16.gmra.mxu3 %vm431_vm1, %v666_v11 }
 0x16e   : > { %v453_v12 = vpop.f32.mrf.mxu1 }
 0x16f   : > { %473 = vst [vmem:[%s258_s25] sm:$0xff] %v453_v12 }
 0x174   : > { %v458_v13 = vpop.f32.mrf.mxu3 }
 0x175   : > { %475 = vst [vmem:[%s258_s25 + $0x10] sm:$0xff] %v458_v13 }
 0x176   : > { %v455_v14 = vpop.f32.mrf.mxu1 }
 0x177   : > { %474 = vst [vmem:[%s258_s25 + $0x8] sm:$0xff] %v455_v14 }
 0x17c   : > { %v460_v15 = vpop.f32.mrf.mxu3 }
 0x17d   : > { %476 = vst [vmem:[%s258_s25 + $0x18] sm:$0xff] %v460_v15 }
 0x184   : > { %v463_v16 = vpop.f32.mrf.mxu3 }
 0x185   : > { %477 = vst [vmem:[%s258_s25 + $0x20] sm:$0xff] %v463_v16 }
 0x18c   : > { %v465_v17 = vpop.f32.mrf.mxu3 }
 0x18d   : > { %478 = vst [vmem:[%s258_s25 + $0x28] sm:$0xff] %v465_v17 }
 0x194   : > { %v468_v18 = vpop.f32.mrf.mxu3 }
 0x195   : > { %479 = vst [vmem:[%s258_s25 + $0x30] sm:$0xff] %v468_v18 }
 0x19c   : > { %v470_v19 = vpop.f32.mrf.mxu3 }
 0x19d   : > { %480 = vst [vmem:[%s258_s25 + $0x38] sm:$0xff] %v470_v19 }
 0x19e   : > { %841 = shalt.err (!%p838_p0)
}
 0x19f   : > { %s905_s10 = smov 128   ;;  %s906_s11 = smov 8  }
 0x1a0   : > { %683 = dma.vmem_to_hbm [thread:$0]  (%p1014_p5), %s496_s13, 1024, %s498_s14, %s482_s27, %s905_s10, %s905_s10, %s906_s11  }
 0x1a1 PF: > { %s512_s1 = sand.u32 1, %s880_s15   ;;  %p694_p3 = pnand %p599_p11, %p981_p6 }
 0x1a2   : > { %s513_s23 = scalar_lea.sflag [#allocation4], %s512_s1 }
 0x1a3   : > { %p695_p7 = pneg %p694_p3 }
 0x1a5   : > { %875 = dma.done.wait (%p695_p7), %s513_s23, 1024  }
 0x1a6   : > { %877 = vsyncadd (%p695_p7), %s513_s23, 4294966272  ;;  %s21_s20 = sadd.s32 1, %s900_s20   ;;  %s1138_s12 = sld [smem:[#allocation11_spill]] }
 0x1a7   : > { %p18_p9 = scmp.ge.s32.totalorder %s21_s20, 4   ;;  %s1139_s15 = smov %s884_s16 }
 0x1a8   : > { %s1140_s16 = smov %s888_s17  ;;  %s1141_s17 = smov %s1023_s22 }
 0x1a9   : > { %s1142_s18 = smov %s896_s19  ;;  %20 = sbr.rel (!%p18_p9) target bundleno = 9 (0x9), region = 87 }
 0x1ac   : > { %s1143_s19 = smov %s1138_s12 }
 0x1ae   :  { %519 = vsyncpa [#allocation3], 1 }
 0x1af   :  { %521 = vsyncpa [#allocation3 + $0x1], 1 }
 0x1b0   :  { %522 = vsyncpa [#allocation6], 1 }
 0x1b1   :  { %523 = vsyncpa [#allocation4], 1 }
 0x1b2   :  { %525 = vsyncpa [#allocation4 + $0x1], 1 }

</bundles_post_ra>
